<compile_context>
chip_gen: v7x
topology: tpu7x:2x2x1
jax: 0.10.0
libtpu: 0.0.40
codegen_flags: <defaults>
</compile_context>

<pallas_src>
import math

import jax
import jax.numpy as jnp
from jax import lax
from jax.experimental import pallas as pl
from jax.experimental.pallas import tpu as pltpu


def _attention_kernel(locx_ref, glox_ref,
                      wq_ref, bq_ref,
                      wk_ref, bk_ref,
                      wv_ref, bv_ref,
                      wo_ref, bo_ref,
                      out_ref,
                      k_cache_ref, v_cache_ref, acc_ref):
    """Grid = (batch, Sq-tile, head).  Head axis accumulates into out tile."""
    i = pl.program_id(1)          # query-tile index
    h = pl.program_id(2)          # head index

    @pl.when(h == 0)
    def _init():
        acc_ref[...] = jnp.zeros_like(acc_ref)

    # Per-head K/V projections: computed once per (batch, head) on the first
    # query tile, cached in VMEM and reused for every later query tile.
    @pl.when(i == 0)
    def _project_kv():
        g = glox_ref[...]                                     # (Sk, H)  bf16
        k = jnp.dot(g, wk_ref[...],
                    preferred_element_type=jnp.float32) + bk_ref[...]
        v = jnp.dot(g, wv_ref[...],
                    preferred_element_type=jnp.float32) + bv_ref[...]
        k_cache_ref[h] = k.astype(jnp.bfloat16)               # (Sk, hd)
        v_cache_ref[h] = v.astype(jnp.bfloat16)               # (Sk, hd)

    x = locx_ref[...]                                         # (tq, H)  bf16

    # Per-head Q projection: bf16 MXU operands, f32 accumulation.
    # (1/sqrt(head_dim) is pre-folded into wq/bq on the host.)
    q = jnp.dot(x, wq_ref[...],
                preferred_element_type=jnp.float32) + bq_ref[...]

    k = k_cache_ref[h]                                        # (Sk, hd) bf16
    v = v_cache_ref[h]                                        # (Sk, hd) bf16

    # Scores (tq, Sk): contraction over head_dim; keys stay in the lane dim.
    scores = lax.dot_general(q.astype(jnp.bfloat16), k,
                             (((1,), (1,)), ((), ())),
                             preferred_element_type=jnp.float32)

    # Softmax over keys in f32; divide goes to the EUP via approx reciprocal.
    m = jnp.max(scores, axis=-1, keepdims=True)
    e = jnp.exp(scores - m)
    denom = jnp.sum(e, axis=-1, keepdims=True)
    probs = e * pl.reciprocal(denom, approx=True)
    # attn_dropout / proj_dropout have rate 0.0 -> identity (omitted).

    # Context for this head: (tq, hd).
    ctx = jnp.dot(probs.astype(jnp.bfloat16), v,
                  preferred_element_type=jnp.float32)

    # Per-head slice of the output projection, accumulated over heads
    # into a lane-dense (tq, H) tile.
    acc_ref[...] += jnp.dot(ctx.astype(jnp.bfloat16), wo_ref[...],
                            preferred_element_type=jnp.float32)

    @pl.when(h == pl.num_programs(2) - 1)
    def _finalize():
        out_ref[...] = (acc_ref[...] + bo_ref[...]).astype(out_ref.dtype)


def _pick_q_tile(sq):
    """Largest convenient Sq tile that divides Sq (full axis if small)."""
    if sq <= 256:
        return sq
    for t in (256, 128, 64, 32, 16, 8):
        if sq % t == 0:
            return t
    return sq


def global_attention(locx, glox, params, *, num_heads, q_tile=None):
    """locx: (B, Sq, H), glox: (B, Sk, H). Returns (B, Sq, H) in locx.dtype."""
    B, Sq, H = locx.shape
    _, Sk, _ = glox.shape
    assert H % num_heads == 0
    nh = num_heads
    hd = H // nh

    wq, bq, wk, bk, wv, bv, wo, bo = params
    scale = 1.0 / math.sqrt(hd)

    def split_heads_w(w_t):     # (H_in, H_out) -> (nh, H_in, hd)
        return w_t.reshape(H, nh, hd).transpose(1, 0, 2)

    # Host-side prep: transpose to (in, out), split per head, fold the
    # attention scale into the query projection, cast matmul operands to bf16.
    wq_h = split_heads_w(wq.T * scale).astype(jnp.bfloat16)     # (nh, H, hd)
    wk_h = split_heads_w(wk.T).astype(jnp.bfloat16)             # (nh, H, hd)
    wv_h = split_heads_w(wv.T).astype(jnp.bfloat16)             # (nh, H, hd)
    wo_h = wo.T.reshape(nh, hd, H).astype(jnp.bfloat16)         # (nh, hd, H)

    bq_h = (bq * scale).reshape(nh, 1, hd).astype(jnp.float32)
    bk_h = bk.reshape(nh, 1, hd).astype(jnp.float32)
    bv_h = bv.reshape(nh, 1, hd).astype(jnp.float32)
    bo_2 = bo.reshape(1, H).astype(jnp.float32)

    locx_bf = locx.astype(jnp.bfloat16)
    glox_bf = glox.astype(jnp.bfloat16)

    tq = q_tile if q_tile is not None else _pick_q_tile(Sq)
    assert Sq % tq == 0
    assert tq == Sq or tq % 8 == 0
    n_tq = Sq // tq
    grid = (B, n_tq, nh)

    act_q_spec = pl.BlockSpec((None, tq, H), lambda b, i, h: (b, i, 0))
    act_k_spec = pl.BlockSpec((None, Sk, H), lambda b, i, h: (b, 0, 0))
    whead_spec = pl.BlockSpec((None, H, hd), lambda b, i, h: (h, 0, 0))
    bhead_spec = pl.BlockSpec((None, 1, hd), lambda b, i, h: (h, 0, 0))
    wo_spec = pl.BlockSpec((None, hd, H), lambda b, i, h: (h, 0, 0))
    bo_spec = pl.BlockSpec((1, H), lambda b, i, h: (0, 0))
    out_spec = pl.BlockSpec((None, tq, H), lambda b, i, h: (b, i, 0))

    # Rough per-step VMEM estimate (double-buffered inputs/outputs + scratch +
    # live intermediates), with headroom; clamp to a range safe on v5e/v6e/v7x.
    bf, f32 = 2, 4
    vmem_est = (
        2 * tq * H * bf + 2 * Sk * H * bf
        + 2 * 3 * H * hd * bf + 2 * hd * H * bf
        + 2 * 3 * hd * f32 + 2 * H * f32
        + 2 * tq * H * f32 + tq * H * f32
        + 2 * nh * Sk * hd * bf                      # persistent K/V caches
        + (tq * hd + 2 * Sk * hd + 3 * tq * Sk + tq * H) * f32
    )
    vmem_limit = int(min(max(2 * vmem_est, 32 * 1024 * 1024), 64 * 1024 * 1024))

    return pl.pallas_call(
        _attention_kernel,
        out_shape=jax.ShapeDtypeStruct((B, Sq, H), locx.dtype),
        grid_spec=pltpu.PrefetchScalarGridSpec(
            num_scalar_prefetch=0,
            grid=grid,
            in_specs=[act_q_spec, act_k_spec,
                      whead_spec, bhead_spec,    # query
                      whead_spec, bhead_spec,    # key
                      whead_spec, bhead_spec,    # value
                      wo_spec, bo_spec],         # out projection
            out_specs=out_spec,
            scratch_shapes=[pltpu.VMEM((nh, Sk, hd), jnp.bfloat16),   # K cache
                            pltpu.VMEM((nh, Sk, hd), jnp.bfloat16),   # V cache
                            pltpu.VMEM((tq, H), jnp.float32)],        # out acc
        ),
        compiler_params=pltpu.CompilerParams(
            # Sq-tile axis must be sequential so the per-head K/V cache filled
            # at i == 0 is valid for every later query tile of the same batch.
            dimension_semantics=("parallel", "arbitrary", "arbitrary"),
            vmem_limit_bytes=vmem_limit),
    )(locx_bf, glox_bf, wq_h, bq_h, wk_h, bk_h, wv_h, bv_h, wo_h, bo_2)


def _reference(locx, glox, params, *, num_heads):
    """Plain-JAX f32 reference mirroring the PyTorch forward."""
    wq, bq, wk, bk, wv, bv, wo, bo = params
    B, Sq, H = locx.shape
    Sk = glox.shape[1]
    hd = H // num_heads

    def lin(x, w, b):
        return x @ w.T + b

    q = lin(locx, wq, bq).reshape(B, Sq, num_heads, hd).transpose(0, 2, 1, 3)
    k = lin(glox, wk, bk).reshape(B, Sk, num_heads, hd).transpose(0, 2, 1, 3)
    v = lin(glox, wv, bv).reshape(B, Sk, num_heads, hd).transpose(0, 2, 1, 3)
    scores = jnp.einsum('bhqd,bhkd->bhqk', q, k) / math.sqrt(hd)
    probs = jax.nn.softmax(scores, axis=-1)
    ctx = jnp.einsum('bhqk,bhkd->bhqd', probs, v)
    ctx = ctx.transpose(0, 2, 1, 3).reshape(B, Sq, H)
    return lin(ctx, wo, bo)


def _make_params(key, H):
    keys = jax.random.split(key, 8)
    bound = 1.0 / math.sqrt(H)
    mk = lambda k, shape: jax.random.uniform(k, shape, jnp.float32, -bound, bound)
    wq, bq = mk(keys[0], (H, H)), mk(keys[1], (H,))
    wk, bk = mk(keys[2], (H, H)), mk(keys[3], (H,))
    wv, bv = mk(keys[4], (H, H)), mk(keys[5], (H,))
    wo, bo = mk(keys[6], (H, H)), mk(keys[7], (H,))
    return (wq, bq, wk, bk, wv, bv, wo, bo)


def _check(out, ref):
    max_err = float(jnp.max(jnp.abs(out - ref)))
    # Tolerance loosened vs a pure-f32 version: matmul operands are bf16.
    assert jnp.allclose(out, ref, atol=5e-2, rtol=5e-2), (
        f"mismatch vs JAX reference (max abs err {max_err})")


if __name__ == "__main__":
    # Small shapes consistent with the module's forward (hidden divisible by heads).
    key = jax.random.PRNGKey(0)
    kp, ka, kb, kc, kd = jax.random.split(key, 5)

    # Test 1: single query tile (Sq == tile).
    B, Sq, Sk, H, NH = 2, 8, 8, 32, 4
    params = _make_params(kp, H)
    locx = jax.random.normal(ka, (B, Sq, H), jnp.float32)
    glox = jax.random.normal(kb, (B, Sk, H), jnp.float32)

    out = global_attention(locx, glox, params, num_heads=NH)
    out = jax.block_until_ready(out)
    assert out.shape == (B, Sq, H)
    _check(out, _reference(locx, glox, params, num_heads=NH))

    # Test 2: multiple query tiles (exercises the cached K/V reuse path).
    B2, Sq2, Sk2 = 2, 16, 8
    locx2 = jax.random.normal(kc, (B2, Sq2, H), jnp.float32)
    glox2 = jax.random.normal(kd, (B2, Sk2, H), jnp.float32)
    out2 = global_attention(locx2, glox2, params, num_heads=NH, q_tile=8)
    out2 = jax.block_until_ready(out2)
    assert out2.shape == (B2, Sq2, H)
    _check(out2, _reference(locx2, glox2, params, num_heads=NH))

    print("KERNEL_OK")
</pallas_src>

<mosaic_0001>
module attributes {stable_mosaic.version = 11 : i64} {
  func.func @_attention_kernel(%arg0: i32, %arg1: i32, %arg2: i32, %arg3: memref<1x8x32xbf16, #tpu.memory_space<vmem>>, %arg4: memref<1x8x32xbf16, #tpu.memory_space<vmem>>, %arg5: memref<1x32x8xbf16, #tpu.memory_space<vmem>>, %arg6: memref<1x1x8xf32, #tpu.memory_space<vmem>>, %arg7: memref<1x32x8xbf16, #tpu.memory_space<vmem>>, %arg8: memref<1x1x8xf32, #tpu.memory_space<vmem>>, %arg9: memref<1x32x8xbf16, #tpu.memory_space<vmem>>, %arg10: memref<1x1x8xf32, #tpu.memory_space<vmem>>, %arg11: memref<1x8x32xbf16, #tpu.memory_space<vmem>>, %arg12: memref<1x32xf32, #tpu.memory_space<vmem>>, %arg13: memref<1x8x32xf32, #tpu.memory_space<vmem>>, %arg14: memref<4x8x8xbf16, #tpu.memory_space<vmem>>, %arg15: memref<4x8x8xbf16, #tpu.memory_space<vmem>>, %arg16: memref<8x32xf32, #tpu.memory_space<vmem>>) attributes {dimension_semantics = [#tpu.dimension_semantics<parallel>, #tpu.dimension_semantics<arbitrary>, #tpu.dimension_semantics<arbitrary>], iteration_bounds = array<i64: 2, 1, 4>, scalar_prefetch = 0 : i64, scratch_operands = 3 : i64, tpu.core_type = #tpu.core_type<tc>, window_params = [{transform_indices = @transform_0, window_bounds = array<i64: 1, 8, 32>}, {transform_indices = @transform_1, window_bounds = array<i64: 1, 8, 32>}, {transform_indices = @transform_2, window_bounds = array<i64: 1, 32, 8>}, {transform_indices = @transform_3, window_bounds = array<i64: 1, 1, 8>}, {transform_indices = @transform_4, window_bounds = array<i64: 1, 32, 8>}, {transform_indices = @transform_5, window_bounds = array<i64: 1, 1, 8>}, {transform_indices = @transform_6, window_bounds = array<i64: 1, 32, 8>}, {transform_indices = @transform_7, window_bounds = array<i64: 1, 1, 8>}, {transform_indices = @transform_8, window_bounds = array<i64: 1, 8, 32>}, {pipeline_mode = #tpu.pipeline_mode<synchronous>, transform_indices = @transform_9, window_bounds = array<i64: 1, 32>}, {transform_indices = @transform_10, window_bounds = array<i64: 1, 8, 32>}]} {
    %c0_i32 = arith.constant 0 : i32
    %0 = arith.cmpi eq, %arg2, %c0_i32 : i32
    %1 = arith.extui %0 : i1 to i32
    %c0_i32_0 = arith.constant 0 : i32
    %2 = arith.cmpi ne, %1, %c0_i32_0 : i32
    scf.if %2 {
      %cst_28 = arith.constant 0.000000e+00 : f32
      %45 = vector.broadcast %cst_28 : f32 to vector<8x32xf32>
      %c0_29 = arith.constant 0 : index
      %c0_30 = arith.constant 0 : index
      %46 = vector.load %arg16[%c0_29, %c0_30] : memref<8x32xf32, #tpu.memory_space<vmem>>, vector<8x32xf32>
      tpu.vector_store %arg16[%c0_29, %c0_30], %45 {strides = array<i32>} : memref<8x32xf32, #tpu.memory_space<vmem>>, vector<8x32xf32>,
    } else {
    }
    %c0_i32_1 = arith.constant 0 : i32
    %3 = arith.cmpi eq, %arg1, %c0_i32_1 : i32
    %4 = arith.extui %3 : i1 to i32
    %c0_i32_2 = arith.constant 0 : i32
    %5 = arith.cmpi ne, %4, %c0_i32_2 : i32
    scf.if %5 {
      %c0_28 = arith.constant 0 : index
      %c0_29 = arith.constant 0 : index
      %c0_30 = arith.constant 0 : index
      %45 = vector.load %arg4[%c0_28, %c0_29, %c0_30] : memref<1x8x32xbf16, #tpu.memory_space<vmem>>, vector<1x8x32xbf16>
      %46 = vector.shape_cast %45 : vector<1x8x32xbf16> to vector<8x32xbf16>
      %c0_31 = arith.constant 0 : index
      %c0_32 = arith.constant 0 : index
      %c0_33 = arith.constant 0 : index
      %47 = vector.load %arg7[%c0_31, %c0_32, %c0_33] : memref<1x32x8xbf16, #tpu.memory_space<vmem>>, vector<1x32x8xbf16>
      %48 = vector.shape_cast %47 : vector<1x32x8xbf16> to vector<32x8xbf16>
      %cst_34 = arith.constant dense<0.000000e+00> : vector<8x8xf32>
      %49 = tpu.matmul %46, %48, %cst_34 {dimension_numbers = #tpu.dot_dimension_numbers<[1], [0], [0], [1], [0, 0, 1, 1], [], []>} : vector<8x32xbf16>, vector<32x8xbf16>, vector<8x8xf32> -> vector<8x8xf32>
      %c0_35 = arith.constant 0 : index
      %c0_36 = arith.constant 0 : index
      %c0_37 = arith.constant 0 : index
      %50 = vector.load %arg8[%c0_35, %c0_36, %c0_37] : memref<1x1x8xf32, #tpu.memory_space<vmem>>, vector<1x1x8xf32>
      %51 = vector.shape_cast %50 : vector<1x1x8xf32> to vector<1x8xf32>
      %52 = vector.broadcast %51 : vector<1x8xf32> to vector<8x8xf32>
      %53 = arith.addf %49, %52 : vector<8x8xf32>
      %c0_38 = arith.constant 0 : index
      %c0_39 = arith.constant 0 : index
      %c0_40 = arith.constant 0 : index
      %54 = vector.load %arg9[%c0_38, %c0_39, %c0_40] : memref<1x32x8xbf16, #tpu.memory_space<vmem>>, vector<1x32x8xbf16>
      %55 = vector.shape_cast %54 : vector<1x32x8xbf16> to vector<32x8xbf16>
      %cst_41 = arith.constant dense<0.000000e+00> : vector<8x8xf32>
      %56 = tpu.matmul %46, %55, %cst_41 {dimension_numbers = #tpu.dot_dimension_numbers<[1], [0], [0], [1], [0, 0, 1, 1], [], []>} : vector<8x32xbf16>, vector<32x8xbf16>, vector<8x8xf32> -> vector<8x8xf32>
      %c0_42 = arith.constant 0 : index
      %c0_43 = arith.constant 0 : index
      %c0_44 = arith.constant 0 : index
      %57 = vector.load %arg10[%c0_42, %c0_43, %c0_44] : memref<1x1x8xf32, #tpu.memory_space<vmem>>, vector<1x1x8xf32>
      %58 = vector.shape_cast %57 : vector<1x1x8xf32> to vector<1x8xf32>
      %59 = vector.broadcast %58 : vector<1x8xf32> to vector<8x8xf32>
      %60 = arith.addf %56, %59 : vector<8x8xf32>
      %61 = arith.truncf %53 : vector<8x8xf32> to vector<8x8xbf16>
      %62 = arith.index_cast %arg2 : i32 to index
      %c0_45 = arith.constant 0 : index
      %c0_46 = arith.constant 0 : index
      %63 = vector.load %arg14[%62, %c0_45, %c0_46] : memref<4x8x8xbf16, #tpu.memory_space<vmem>>, vector<1x8x8xbf16>
      %64 = vector.shape_cast %63 : vector<1x8x8xbf16> to vector<8x8xbf16>
      %65 = vector.shape_cast %61 : vector<8x8xbf16> to vector<1x8x8xbf16>
      tpu.vector_store %arg14[%62, %c0_45, %c0_46], %65 {strides = array<i32>} : memref<4x8x8xbf16, #tpu.memory_space<vmem>>, vector<1x8x8xbf16>,
      %66 = arith.truncf %60 : vector<8x8xf32> to vector<8x8xbf16>
      %67 = arith.index_cast %arg2 : i32 to index
      %c0_47 = arith.constant 0 : index
      %c0_48 = arith.constant 0 : index
      %68 = vector.load %arg15[%67, %c0_47, %c0_48] : memref<4x8x8xbf16, #tpu.memory_space<vmem>>, vector<1x8x8xbf16>
      %69 = vector.shape_cast %68 : vector<1x8x8xbf16> to vector<8x8xbf16>
      %70 = vector.shape_cast %66 : vector<8x8xbf16> to vector<1x8x8xbf16>
      tpu.vector_store %arg15[%67, %c0_47, %c0_48], %70 {strides = array<i32>} : memref<4x8x8xbf16, #tpu.memory_space<vmem>>, vector<1x8x8xbf16>,
    } else {
    }
    %c0 = arith.constant 0 : index
    %c0_3 = arith.constant 0 : index
    %c0_4 = arith.constant 0 : index
    %6 = vector.load %arg3[%c0, %c0_3, %c0_4] : memref<1x8x32xbf16, #tpu.memory_space<vmem>>, vector<1x8x32xbf16>
    %7 = vector.shape_cast %6 : vector<1x8x32xbf16> to vector<8x32xbf16>
    %c0_5 = arith.constant 0 : index
    %c0_6 = arith.constant 0 : index
    %c0_7 = arith.constant 0 : index
    %8 = vector.load %arg5[%c0_5, %c0_6, %c0_7] : memref<1x32x8xbf16, #tpu.memory_space<vmem>>, vector<1x32x8xbf16>
    %9 = vector.shape_cast %8 : vector<1x32x8xbf16> to vector<32x8xbf16>
    %cst = arith.constant dense<0.000000e+00> : vector<8x8xf32>
    %10 = tpu.matmul %7, %9, %cst {dimension_numbers = #tpu.dot_dimension_numbers<[1], [0], [0], [1], [0, 0, 1, 1], [], []>} : vector<8x32xbf16>, vector<32x8xbf16>, vector<8x8xf32> -> vector<8x8xf32>
    %c0_8 = arith.constant 0 : index
    %c0_9 = arith.constant 0 : index
    %c0_10 = arith.constant 0 : index
    %11 = vector.load %arg6[%c0_8, %c0_9, %c0_10] : memref<1x1x8xf32, #tpu.memory_space<vmem>>, vector<1x1x8xf32>
    %12 = vector.shape_cast %11 : vector<1x1x8xf32> to vector<1x8xf32>
    %13 = vector.broadcast %12 : vector<1x8xf32> to vector<8x8xf32>
    %14 = arith.addf %10, %13 : vector<8x8xf32>
    %15 = arith.index_cast %arg2 : i32 to index
    %c0_11 = arith.constant 0 : index
    %c0_12 = arith.constant 0 : index
    %16 = vector.load %arg14[%15, %c0_11, %c0_12] : memref<4x8x8xbf16, #tpu.memory_space<vmem>>, vector<1x8x8xbf16>
    %17 = vector.shape_cast %16 : vector<1x8x8xbf16> to vector<8x8xbf16>
    %18 = arith.index_cast %arg2 : i32 to index
    %c0_13 = arith.constant 0 : index
    %c0_14 = arith.constant 0 : index
    %19 = vector.load %arg15[%18, %c0_13, %c0_14] : memref<4x8x8xbf16, #tpu.memory_space<vmem>>, vector<1x8x8xbf16>
    %20 = vector.shape_cast %19 : vector<1x8x8xbf16> to vector<8x8xbf16>
    %21 = arith.truncf %14 : vector<8x8xf32> to vector<8x8xbf16>
    %cst_15 = arith.constant dense<0.000000e+00> : vector<8x8xf32>
    %22 = tpu.matmul %21, %17, %cst_15 {dimension_numbers = #tpu.dot_dimension_numbers<[1], [1], [0], [0], [0, 0, 1, 0], [], []>} : vector<8x8xbf16>, vector<8x8xbf16>, vector<8x8xf32> -> vector<8x8xf32>
    %cst_16 = arith.constant dense<0xFF800000> : vector<8xf32>
    %23 = vector.multi_reduction <maximumf>, %22, %cst_16 [1] : vector<8x8xf32> to vector<8xf32>
    %24 = vector.shape_cast %23 : vector<8xf32> to vector<8x1xf32>
    %25 = vector.broadcast %24 : vector<8x1xf32> to vector<8x8xf32>
    %26 = arith.subf %22, %25 : vector<8x8xf32>
    %27 = math.exp %26 : vector<8x8xf32>
    %cst_17 = arith.constant dense<0.000000e+00> : vector<8xf32>
    %28 = vector.multi_reduction <add>, %27, %cst_17 [1] : vector<8x8xf32> to vector<8xf32>
    %29 = vector.shape_cast %28 : vector<8xf32> to vector<8x1xf32>
    %30 = tpu.reciprocal %29 {approx = true} : vector<8x1xf32> -> vector<8x1xf32>
    %31 = vector.broadcast %30 : vector<8x1xf32> to vector<8x8xf32>
    %32 = arith.mulf %27, %31 : vector<8x8xf32>
    %33 = arith.truncf %32 : vector<8x8xf32> to vector<8x8xbf16>
    %cst_18 = arith.constant dense<0.000000e+00> : vector<8x8xf32>
    %34 = tpu.matmul %33, %20, %cst_18 {dimension_numbers = #tpu.dot_dimension_numbers<[1], [0], [0], [1], [0, 0, 1, 1], [], []>} : vector<8x8xbf16>, vector<8x8xbf16>, vector<8x8xf32> -> vector<8x8xf32>
    %c0_19 = arith.constant 0 : index
    %c0_20 = arith.constant 0 : index
    %35 = vector.load %arg16[%c0_19, %c0_20] : memref<8x32xf32, #tpu.memory_space<vmem>>, vector<8x32xf32>
    %36 = arith.truncf %34 : vector<8x8xf32> to vector<8x8xbf16>
    %c0_21 = arith.constant 0 : index
    %c0_22 = arith.constant 0 : index
    %c0_23 = arith.constant 0 : index
    %37 = vector.load %arg11[%c0_21, %c0_22, %c0_23] : memref<1x8x32xbf16, #tpu.memory_space<vmem>>, vector<1x8x32xbf16>
    %38 = vector.shape_cast %37 : vector<1x8x32xbf16> to vector<8x32xbf16>
    %cst_24 = arith.constant dense<0.000000e+00> : vector<8x32xf32>
    %39 = tpu.matmul %36, %38, %cst_24 {dimension_numbers = #tpu.dot_dimension_numbers<[1], [0], [0], [1], [0, 0, 1, 1], [], []>} : vector<8x8xbf16>, vector<8x32xbf16>, vector<8x32xf32> -> vector<8x32xf32>
    %40 = arith.addf %35, %39 : vector<8x32xf32>
    %c0_25 = arith.constant 0 : index
    %c0_26 = arith.constant 0 : index
    %41 = vector.load %arg16[%c0_25, %c0_26] : memref<8x32xf32, #tpu.memory_space<vmem>>, vector<8x32xf32>
    tpu.vector_store %arg16[%c0_25, %c0_26], %40 {strides = array<i32>} : memref<8x32xf32, #tpu.memory_space<vmem>>, vector<8x32xf32>,
    %c3_i32 = arith.constant 3 : i32
    %42 = arith.cmpi eq, %arg2, %c3_i32 : i32
    %43 = arith.extui %42 : i1 to i32
    %c0_i32_27 = arith.constant 0 : i32
    %44 = arith.cmpi ne, %43, %c0_i32_27 : i32
    scf.if %44 {
      %c0_28 = arith.constant 0 : index
      %c0_29 = arith.constant 0 : index
      %45 = vector.load %arg16[%c0_28, %c0_29] : memref<8x32xf32, #tpu.memory_space<vmem>>, vector<8x32xf32>
      %c0_30 = arith.constant 0 : index
      %c0_31 = arith.constant 0 : index
      %46 = vector.load %arg12[%c0_30, %c0_31] : memref<1x32xf32, #tpu.memory_space<vmem>>, vector<1x32xf32>
      %47 = vector.broadcast %46 : vector<1x32xf32> to vector<8x32xf32>
      %48 = arith.addf %45, %47 : vector<8x32xf32>
      %c0_32 = arith.constant 0 : index
      %c0_33 = arith.constant 0 : index
      %c0_34 = arith.constant 0 : index
      %49 = vector.load %arg13[%c0_32, %c0_33, %c0_34] : memref<1x8x32xf32, #tpu.memory_space<vmem>>, vector<1x8x32xf32>
      %50 = vector.shape_cast %49 : vector<1x8x32xf32> to vector<8x32xf32>
      %51 = vector.shape_cast %48 : vector<8x32xf32> to vector<1x8x32xf32>
      tpu.vector_store %arg13[%c0_32, %c0_33, %c0_34], %51 {strides = array<i32>} : memref<1x8x32xf32, #tpu.memory_space<vmem>>, vector<1x8x32xf32>,
    } else {
    }
    return
  }
  func.func @transform_0(%arg0: i32, %arg1: i32, %arg2: i32) -> (i32, i32, i32) {
    %c0_i32 = arith.constant 0 : i32
    %c0_i32_0 = arith.constant 0 : i32
    return %arg0, %arg1, %c0_i32 : i32, i32, i32
  }
  func.func @transform_1(%arg0: i32, %arg1: i32, %arg2: i32) -> (i32, i32, i32) {
    %c0_i32 = arith.constant 0 : i32
    %c0_i32_0 = arith.constant 0 : i32
    %c0_i32_1 = arith.constant 0 : i32
    return %arg0, %c0_i32, %c0_i32_0 : i32, i32, i32
  }
  func.func @transform_2(%arg0: i32, %arg1: i32, %arg2: i32) -> (i32, i32, i32) {
    %c0_i32 = arith.constant 0 : i32
    %c0_i32_0 = arith.constant 0 : i32
    %c0_i32_1 = arith.constant 0 : i32
    return %arg2, %c0_i32, %c0_i32_0 : i32, i32, i32
  }
  func.func @transform_3(%arg0: i32, %arg1: i32, %arg2: i32) -> (i32, i32, i32) {
    %c0_i32 = arith.constant 0 : i32
    %c0_i32_0 = arith.constant 0 : i32
    %c0_i32_1 = arith.constant 0 : i32
    return %arg2, %c0_i32, %c0_i32_0 : i32, i32, i32
  }
  func.func @transform_4(%arg0: i32, %arg1: i32, %arg2: i32) -> (i32, i32, i32) {
    %c0_i32 = arith.constant 0 : i32
    %c0_i32_0 = arith.constant 0 : i32
    %c0_i32_1 = arith.constant 0 : i32
    return %arg2, %c0_i32, %c0_i32_0 : i32, i32, i32
  }
  func.func @transform_5(%arg0: i32, %arg1: i32, %arg2: i32) -> (i32, i32, i32) {
    %c0_i32 = arith.constant 0 : i32
    %c0_i32_0 = arith.constant 0 : i32
    %c0_i32_1 = arith.constant 0 : i32
    return %arg2, %c0_i32, %c0_i32_0 : i32, i32, i32
  }
  func.func @transform_6(%arg0: i32, %arg1: i32, %arg2: i32) -> (i32, i32, i32) {
    %c0_i32 = arith.constant 0 : i32
    %c0_i32_0 = arith.constant 0 : i32
    %c0_i32_1 = arith.constant 0 : i32
    return %arg2, %c0_i32, %c0_i32_0 : i32, i32, i32
  }
  func.func @transform_7(%arg0: i32, %arg1: i32, %arg2: i32) -> (i32, i32, i32) {
    %c0_i32 = arith.constant 0 : i32
    %c0_i32_0 = arith.constant 0 : i32
    %c0_i32_1 = arith.constant 0 : i32
    return %arg2, %c0_i32, %c0_i32_0 : i32, i32, i32
  }
  func.func @transform_8(%arg0: i32, %arg1: i32, %arg2: i32) -> (i32, i32, i32) {
    %c0_i32 = arith.constant 0 : i32
    %c0_i32_0 = arith.constant 0 : i32
    %c0_i32_1 = arith.constant 0 : i32
    return %arg2, %c0_i32, %c0_i32_0 : i32, i32, i32
  }
  func.func @transform_9(%arg0: i32, %arg1: i32, %arg2: i32) -> (i32, i32) {
    %c0_i32 = arith.constant 0 : i32
    %c0_i32_0 = arith.constant 0 : i32
    %c0_i32_1 = arith.constant 0 : i32
    return %c0_i32, %c0_i32_0 : i32, i32
  }
  func.func @transform_10(%arg0: i32, %arg1: i32, %arg2: i32) -> (i32, i32, i32) {
    %c0_i32 = arith.constant 0 : i32
    %c0_i32_0 = arith.constant 0 : i32
    return %arg0, %arg1, %c0_i32 : i32, i32, i32
  }
}

</mosaic_0001>

<bundles_post_ra>
// kernel: tpu_custom_call.1
= control target key start
LH: loop header
LB: loop body
LE: loop exit
PB: predicated region body
PF: predicated region fallthrough
CT: control target
= control target key end

     0   :  { %s1677_s0 = inlined_call_operand.vmem [shape: bf16[2,8,32], index: 0, kind: input, shape index: {}]   ;;  %s1678_s1 = inlined_call_operand.vmem [shape: bf16[2,8,32], index: 1, kind: input, shape index: {}]   ;;  %s1679_s2 = inlined_call_operand.vmem [shape: bf16[4,32,8], index: 2, kind: input, shape index: {}]   ;;  %s1680_s3 = inlined_call_operand.vmem [shape: f32[4,1,8], index: 3, kind: input, shape index: {}]   ;;  %s1681_s4 = inlined_call_operand.vmem [shape: bf16[4,32,8], index: 4, kind: input, shape index: {}]   ;;  %s1682_s5 = inlined_call_operand.vmem [shape: f32[4,1,8], index: 5, kind: input, shape index: {}]   ;;  %s1683_s6 = inlined_call_operand.vmem [shape: bf16[4,32,8], index: 6, kind: input, shape index: {}]   ;;  %s1684_s7 = inlined_call_operand.vmem [shape: f32[4,1,8], index: 7, kind: input, shape index: {}]   ;;  %s1685_s8 = inlined_call_operand.vmem [shape: bf16[4,8,32], index: 8, kind: input, shape index: {}]   ;;  %s1686_s9 = inlined_call_operand.vmem [shape: f32[1,32], index: 9, kind: input, shape index: {}]   ;;  %s1687_s10 = inlined_call_operand.hbm [shape: f32[2,8,32], index: 10, kind: output, shape index: {}]  }
   0x1   :  { %1701 = sst [smem:[#allocation19_spill]] %s1677_s0 }
   0x2   :  { %1702 = sst [smem:[#allocation20_spill]] %s1678_s1 }
   0x3   :  { %1703 = sst [smem:[#allocation21_spill]] %s1679_s2 }
   0x4   :  { %1704 = sst [smem:[#allocation22_spill]] %s1687_s10 }
   0x5   :  { %15 = vsyncpa [#allocation6], 0 }
   0x6   :  { %17 = vsyncpa [#allocation6 + $0x1], 0  ;;  %s1447_s13 = smov 0   ;;  %s1449_s14 = smov 0  }
   0x7   :  { %s1451_s15 = smov 0   ;;  %s1453_s16 = smov 0  }
   0x8   :  { %s1455_s17 = smov 0   ;;  %s1457_s18 = smov 0  }
   0x9   :  { %s1459_s19 = smov 0   ;;  %s1461_s20 = smov 0  }
   0xa LB: > { %1705 = sst [smem:[#allocation8_spill]] %s1358_s13  ;;  %s1107_s21 = sadd.s32 4294967295, %s1386_s20   ;;  %s1386_s20 = sphi %s1461_s20, %s23_s20   ;;  %s1382_s19 = sphi %s1459_s19, %s1736_s19   ;;  %s1378_s18 = sphi %s1457_s18, %s1735_s18   ;;  %s1374_s17 = sphi %s1455_s17, %s1734_s17   ;;  %s1370_s16 = sphi %s1453_s16, %s1733_s16   ;;  %s1366_s15 = sphi %s1451_s15, %s1732_s15   ;;  %s1362_s14 = sphi %s1449_s14, %s1731_s14   ;;  %s1358_s13 = sphi %s1447_s13, %s1730_s13  }
   0xb   : > { %1706 = sst [smem:[#allocation9_spill]] %s1362_s14  ;;  %s1108_s22 = sadd.s32 4294967294, %s1386_s20  }
   0xc   : > { %1707 = sst [smem:[#allocation10_spill]] %s1366_s15  ;;  %s35_s23 = sadd.s32 1, %s1378_s18 }
   0xd   : > { %1708 = sst [smem:[#allocation11_spill]] %s1378_s18  ;;  %p36_p0 = scmp.ge.s32.totalorder %s35_s23, 4 }
   0xe   : > { %1709 = sst [smem:[#allocation12_spill]] %s1382_s19  ;;  %s42_s24 = sadd.s32 1, %s1382_s19 }
   0xf   : > { %1710 = sst [smem:[#allocation13_spill]] %s1386_s20  ;;  %p318_p1 = scmp.ne.s32.totalorder %s1366_s15, %s1362_s14 }
  0x10   : > { %p319_p2 = scmp.eq.s32.totalorder %s1107_s21, 7  ;;  %s1738_s23 = smov (%p36_p0, %s35_s23), 0 }
  0x11   : > { %1711 = sst [smem:[#allocation14_spill]] %s1738_s23  ;;  %s1740_s24 = smov (!%p36_p0, %s42_s24), %s1382_s19 }
  0x12   : > { %p1496_p3 = por %p319_p2, %p318_p1  ;;  %p324_p4 = scmp.ne.s32.totalorder %s1362_s14, %s1358_s13 }
  0x13   : > { %p44_p5 = scmp.ge.s32.totalorder %s1740_s24, 2  ;;  %p325_p6 = scmp.eq.s32.totalorder %s1108_s22, 7 }
  0x14   : > { %s1712_s25 = scalar_select %p1496_p3, 1, 0 }
  0x15   : > { %p1111_p7 = scmp.ge.s32.totalorder %s1386_s20, 1  ;;  %p412_p8 = scmp.lt.s32.totalorder %s1386_s20, 9 }
  0x16   : > { %1713 = sst [smem:[#allocation15_spill]] %s1712_s25  ;;  %s1742_s24 = smov (%p44_p5, %s1740_s24), 0 }
  0x17   : > { %1714 = sst [smem:[#allocation16_spill]] %s1742_s24  ;;  %p1506_p9 = por %p325_p6, %p324_p4 }
  0x18   : > { %p413_p10 = pnand %p1111_p7, %p412_p8  ;;  %s303_s27 = ssub.s32 %s1382_s19, %s1742_s24 }
  0x19   : > { %s1715_s26 = scalar_select %p1506_p9, 1, 0 }
  0x1a   : > { %s308_s28 = sadd.s32 1, %s1366_s15  ;;  %p306_p11 = scmp.eq.s32.totalorder %s303_s27, 0 }
  0x1b   : > { %1716 = sst [smem:[#allocation17_spill]] %s1715_s26  ;;  %416 = sbr.rel (%p413_p10) target bundleno = 1277 (0x4fd), region = 60 }
  0x1c   : > { %s1514_s29 = scalar_select %p306_p11, %s1366_s15, %s308_s28  }
  0x1d   : > { %s1690_s30 = sand.u32 (!%p413_p10), 1, %s1362_s14   ;;  %p484_p12 = scmp.lt.s32.totalorder (!%p413_p10), %s1374_s17, 1 }
  0x1e   : > { %1717 = sst [smem:[#allocation18_spill]] %s1514_s29  ;;  %s1520_s11 = sshll.u32 (!%p413_p10), %s1690_s30, 3 }
  0x1f   : > { %p495_p13 = scmp.lt.s32.totalorder (!%p413_p10), %s1370_s16, 3  ;;  %s1718_s0 = sld [smem:[#allocation19_spill]] (!%p413_p10) }
  0x20   : > { %s1719_s1 = sld [smem:[#allocation20_spill]] (!%p413_p10)  ;;  %s1720_s2 = sld [smem:[#allocation21_spill]] (!%p413_p10) }
  0x21   : > { %s483_s25 = scalar_lea.vmem (!%p413_p10), [#allocation5], %s1520_s11  ;;  %p1122_p0 = scmp.ne.s32.totalorder (!%p413_p10), %s1370_s16, 0 }
  0x22   : > { %s485_s12 = scalar_select %p484_p12, %s1374_s17, 1 }
  0x23   : > { %s1525_s21 = scalar_select %p495_p13, %s1370_s16, 3 }
  0x24   : > { %s1113_s22 = sshll.u32 %s485_s12, 2  ;;  %527 = sbr.rel (%p1122_p0) target bundleno = 43 (0x2b), region = 64  ;;  %vm528_vm0 = vcmask (!%p1122_p0), 261120   ;;  %v1388_v0 = vmov (!%p1122_p0), 0.0  }
  0x25   : > { %s1530_s24 = scalar_lea.vmem %s1718_s0, %s1113_s22  ;;  %s1148_s18 = sshll.u32 %s1525_s21, 4  ;;  %529 = vst.msk [vmem:[#allocation4] sm:$0xff] (!%p1122_p0), %vm528_vm0, %v1388_v0 }
  0x26   : > { %s494_s30 = scalar_lea.vmem %s1719_s1, %s1113_s22  ;;  %s1543_s10 = scalar_lea.vmem %s1720_s2, %s1148_s18 }
  0x27   : > { %s507_s27 = scalar_lea.vmem %s1681_s4, %s1148_s18  ;;  %s510_s14 = scalar_lea.vmem %s1682_s5, %s1525_s21 }
  0x28   : > { %s1555_s22 = scalar_lea.vmem %s1683_s6, %s1148_s18  ;;  %s518_s26 = scalar_lea.vmem %s1684_s7, %s1525_s21 }
  0x29   : > { %s1121_s13 = sshll.u32 %s1525_s21, 2 }
  0x2a   : > { %s1565_s2 = scalar_lea.vmem %s1685_s8, %s1121_s13 }
  0x2b PF: > { %v1282_v1 = vld [vmem:[%s507_s27] sm:$0xff]   ;;  %v1389_v2 = vmov 0.0   ;;  %v1283_v3 = vld [vmem:[%s507_s27 + $0x8] sm:$0xff]   ;;  %vm1390_vm1 = vmmov 0   ;;  %vm558_vm2 = vcmask 261120   ;;  %vm668_vm3 = vcmask 60416   ;;  %s1721_s12 = scalar_lea.vmem %s1680_s3, %s1525_s21 }
  0x2c   : > { %1166 = vmatprep.subr.bf16.mxu0 %v1389_v2  ;;  %1174 = vmatprep.subr.bf16.mxu1 %v1389_v2  ;;  %v534_v4 = vld [vmem:[%s494_s30] sm:$0xf]  ;;  %v1285_v6 = vld [vmem:[%s1543_s10 + $0x8] sm:$0xff]   ;;  %vm749_vm4 = vcmask 64512   ;;  %vm811_vm5 = vcmask 1043456   ;;  %p1142_p1 = scmp.ne.s32.totalorder %s1370_s16, 3 }
  0x2d   : > { %1167 = vmatpush3.bf16.msra.mxu0 %v1282_v1  ;;  %1170 = vmatprep.mubr.msk.bf16.mxu0 %vm1390_vm1, %v1389_v2  ;;  %v1284_v5 = vld [vmem:[%s1543_s10] sm:$0xff]   ;;  %v1287_v9 = vld [vmem:[%s1555_s22 + $0x8] sm:$0xff]   ;;  %s1131_s10 = sshll.u32 %s1370_s16, 2 }
  0x2e   : > { %1168 = vmatprep.subr.bf16.mxu0 %v1389_v2  ;;  %1178 = vmatprep.mubr.msk.bf16.mxu1 %vm1390_vm1, %v1389_v2  ;;  %v674_v7 = vld [vmem:[%s1530_s24] sm:$0xf]  ;;  %s667_s18 = scalar_lea.vmem [#allocation2], %s1131_s10  ;;  %s672_s28 = scalar_lea.vmem [#allocation3], %s1131_s10 }
  0x2f   : > { %v1286_v8 = vld [vmem:[%s1555_s22] sm:$0xff]  }
  0x30   : > { %1175 = vmatpush3.bf16.msra.mxu1 %v1286_v8  ;;  %v1123_v10 = vld [vmem:[%s510_s14] ss:$0 sm:$0xff] }
  0x31   : > { %1169 = vmatpush3.bf16.msra.mxu0 %v1283_v3  ;;  %1176 = vmatprep.subr.bf16.mxu1 %v1389_v2  ;;  %v1133_v19 = vld [vmem:[%s1721_s12] ss:$0 sm:$0xff] }
  0x32   : > { %1182 = vmatprep.subr.bf16.mxu0 %v1389_v2  ;;  %v1127_v26 = vld [vmem:[%s518_s26] ss:$0 sm:$0xff] }
  0x33   : > { %v857_v45 = vld [vmem:[%s1565_s2] sm:$0xf] }
  0x34   : > { %1171 = vmatmul.mubr.msk.bf16.vlgmr.msra.gmra.mrb[0].mxu0 %vm558_vm2, %v534_v4  ;;  %1177 = vmatpush3.bf16.msra.mxu1 %v1287_v9  ;;  %v862_v46 = vsel %vm811_vm5, %v857_v45, 0  ;;  %v855_v56 = vld [vmem:[#allocation4] sm:$0xff] }
  0x35   : > { %1183 = vmatpush3.bf16.msra.mxu0 %v1284_v5  ;;  %1186 = vmatprep.mubr.msk.bf16.mxu0 %vm1390_vm1, %v1389_v2  ;;  %v1143_v63 = vld [vmem:[%s1686_s9] ss:$0 sm:$0xff] (!%p1142_p1) }
  0x36   : > { %1184 = vmatprep.subr.bf16.mxu0 %v1389_v2  ;;  %1190 = vmatprep.subr.bf16.mxu1 %v1389_v2 }
  0x37   : > { %1179 = vmatmul.mubr.msk.bf16.vlgmr.msra.gmra.mrb[0].mxu1 %vm558_vm2, %v534_v4 }
  0x38   : > { %1192 = vmatprep.mubr.msk.bf16.mxu1 %vm1390_vm1, %v1389_v2 }
  0x39   : > { %1185 = vmatpush3.bf16.msra.mxu0 %v1285_v6 }
  0x3a   : > { %1196 = vmatprep.subr.bf16.mxu0 %v1389_v2 }
  0x3c   : > { %1187 = vmatmul.mubr.msk.bf16.vlgmr.msra.gmra.mrb[4].mxu0 %vm558_vm2, %v674_v7 }
  0x3d   : > { %1198 = vmatprep.mubr.msk.bf16.mxu0 %vm1390_vm1, %v1389_v2 }
 0x107   : > { %v596_v11 = vpop.f32.mrb[0].mxu0 }
 0x108   : > { %v597_v12 = vadd.f32 %v1123_v10, %v596_v11  ;;  %v1172_v13 = vpop.f32.mrb[1].mxu0 }
 0x109   : > { %v599_v14 = vpop.f32.mrb[2].mxu0 }
 0x10a   : > { %v665_v15 = vpack.c.bf16 %v597_v12, %v597_v12  ;;  %v1173_v16 = vpop.f32.mrb[3].mxu0  ;;  %v659_v27 = vpop.f32.mrb[0].mxu1 }
 0x10b   : > { %v660_v28 = vadd.f32 %v1127_v26, %v659_v27  ;;  %v1180_v29 = vpop.f32.mrb[1].mxu1 }
 0x10c   : > { %669 = vst.msk [vmem:[%s667_s18] sm:$0xf] %vm668_vm3, %v665_v15  ;;  %v662_v30 = vpop.f32.mrb[2].mxu1 }
 0x10d   : > { %v670_v31 = vpack.c.bf16 %v660_v28, %v660_v28  ;;  %v1181_v32 = vpop.f32.mrb[3].mxu1 }
 0x10f   : > { %v736_v17 = vpop.f32.mrb[4].mxu0  ;;  %673 = vst.msk [vmem:[%s672_s28] sm:$0xf] %vm668_vm3, %v670_v31 }
 0x110   : > { %v1188_v18 = vpop.f32.mrb[5].mxu0  ;;  %v737_v23 = vadd.f32 %v1133_v19, %v736_v17 }
 0x111   : > { %v739_v20 = vpop.f32.mrb[6].mxu0 }
 0x112   : > { %v1189_v21 = vpop.f32.mrb[7].mxu0  ;;  %v748_v25 = vpack.c.bf16 %v737_v23, %v737_v23 }
 0x113   : > { %v744_v22 = vld [vmem:[%s667_s18] sm:$0xf] }
 0x114   : > { %v754_v24 = vsel %vm749_vm4, %v744_v22, 0 }
 0x115   : > { %1191 = vmatpush3.bf16.xpose.msra.mxu1 %v754_v24 }
 0x116   : > { %1202 = vmatprep.subr.bf16.mxu1 %v1389_v2  ;;  %v747_v33 = vld [vmem:[%s672_s28] sm:$0xf] }
 0x117   : > { %v813_v34 = vsel %vm811_vm5, %v747_v33, 0 }
 0x118   : > { %1197 = vmatpush3.bf16.msra.mxu0 %v813_v34 }
 0x11c   : > { %1193 = vmatmul.mubr.msk.bf16.vlgmr.msra.gmra.mrb[4].mxu1 %vm749_vm4, %v748_v25 }
 0x11d   : > { %1204 = vmatprep.mubr.msk.bf16.mxu1 %vm1390_vm1, %v1389_v2  ;;  %1203 = vmatpush3.bf16.msra.mxu1 %v862_v46 }
 0x1ef   : > { %v790_v35 = vpop.f32.mrb[4].mxu1 }
 0x1f0   : > { %v1194_v36 = vpop.f32.mrb[5].mxu1  ;;  %v796_v37 = vsel %vm749_vm4, %v790_v35, -inf }
 0x1f1   : > { %797 = vmax.xlane.f32.xlu0 %v796_v37  ;;  %v793_v38 = vpop.f32.mrb[6].mxu1 }
 0x1f2   : > { %v1195_v39 = vpop.f32.mrb[7].mxu1 }
 0x27e   : > { %v798_v40 = vpop.xlane.xlu0 %797 }
 0x27f   : > { %v799_v41 = vsub.f32 %v790_v35, %v798_v40 }
 0x281   : > { %v800_v42 = vmul.f32 1.442695, %v799_v41 }
 0x283   : > { %1288 = vpow2.f32 %v800_v42 }
 0x28d   : > { %v1289_v43 = vpop.eup %1288 }
 0x28e   : > { %v802_v44 = vsel %vm749_vm4, %v1289_v43, 0.0 }
 0x28f   : > { %803 = vadd.xlane.f32.xlu0 %v802_v44 }
 0x31c   : > { %v804_v47 = vpop.xlane.xlu0 %803 }
 0x31d   : > { %1290 = vrcp.f32 %v804_v47 }
 0x327   : > { %v1291_v48 = vpop.eup %1290 }
 0x328   : > { %v806_v49 = vmul.f32 %v1291_v48, %v1289_v43 }
 0x32a   : > { %v807_v50 = vpack.c.bf16 %v806_v49, %v806_v49 }
 0x32c   : > { %1199 = vmatmul.mubr.msk.bf16.vlgmr.msra.gmra.mrb[8].mxu0 %vm749_vm4, %v807_v50 }
 0x3ff   : > { %v849_v51 = vpop.f32.mrb[8].mxu0 }
 0x400   : > { %v856_v52 = vpack.c.bf16 %v849_v51, %v849_v51  ;;  %v1200_v53 = vpop.f32.mrb[9].mxu0 }
 0x401   : > { %v852_v54 = vpop.f32.mrb[10].mxu0 }
 0x402   : > { %v1201_v55 = vpop.f32.mrb[11].mxu0  ;;  %1205 = vmatmul.mubr.msk.bf16.vlgmr.msra.gmra.mrb[8].mxu1 %vm749_vm4, %v856_v52 }
 0x4d2   : > { %909 = sbr.rel (%p1142_p1) target bundleno = 1251 (0x4e3), region = 72 }
 0x4d5   : > { %v898_v57 = vpop.f32.mrb[8].mxu1 }
 0x4d6   : > { %v904_v58 = vadd.f32 %v898_v57, %v855_v56  ;;  %v1206_v59 = vpop.f32.mrb[9].mxu1 }
 0x4d7   : > { %v901_v60 = vpop.f32.mrb[10].mxu1 }
 0x4d8   : > { %905 = vst.msk [vmem:[#allocation4] sm:$0xff] %vm558_vm2, %v904_v58  ;;  %v1207_v61 = vpop.f32.mrb[11].mxu1 }
 0x4df   : > { %v910_v62 = vld [vmem:[#allocation4] sm:$0xff] }
 0x4e0   : > { %v918_v0 = vadd.f32 %v1143_v63, %v910_v62 }
 0x4e2   : > { %919 = vst.msk [vmem:[%s483_s25] sm:$0xff] %vm558_vm2, %v918_v0 }
 0x4e3 PF: > { %s1722_s21 = sld [smem:[#allocation9_spill]]  ;;  %s1145_s23 = sshll.u32 %s1374_s17, 7 }
 0x4e4   : > { %s1724_s16 = sld [smem:[#allocation22_spill]]  ;;  %s935_s20 = sshll.u32 %s483_s25, 4  ;;  %s936_s20 = int_to_ptr.vmem [resolvable:$true] %s935_s20 }
 0x4e5   : > { %s1292_s10 = scalar_lea.vmem %s936_s20, 128  ;;  %s1391_s18 = smov [#allocation5]  }
 0x4e6   : > { %p1293_p2 = scmp.ne.s32.totalorder %s936_s20, %s1292_s10  ;;  %s1296_s24 = sshll.u32 %s1391_s18, 4  ;;  %s1297_s24 = int_to_ptr.vmem [resolvable:$false] %s1296_s24 }
 0x4e7   : > { %s1298_s30 = scalar_lea.vmem %s1297_s24, 256  ;;  %p1299_p6 = scmp.lt.s32.totalorder %s936_s20, %s1297_s24 }
 0x4e8   : > { %p1294_p4 = pnand %p1293_p2, %p1496_p3  ;;  %p1300_p7 = scmp.lt.s32.totalorder %s1298_s30, %s1292_s10 }
 0x4e9   : > { %s1726_s0 = sand.u32 1, %s1722_s21  }
 0x4ea   : > { %s1725_s29 = smov %s1724_s16  ;;  %s1626_s13 = scalar_lea.hbm %s1724_s16, %s1145_s23 }
 0x4eb   : > { %s921_s1 = scalar_lea.sflag [#allocation6], %s1726_s0  ;;  %p1295_p5 = pneg %p1294_p4 }
 0x4ec   : > { %p1301_p8 = por %p1300_p7, %p1299_p6 }
 0x4ee   : > { %p1302_p10 = pnand %p1301_p8, %p1295_p5 }
 0x4f0   : > { %1305 = shalt.err (!%p1302_p10)
}
 0x4f1   : > { %s1306_s17 = scalar_lea.hbm %s1626_s13, 128  ;;  %s1310_s12 = scalar_lea.hbm %s1725_s29, 256 }
 0x4f2   : > { %p1307_p11 = scmp.ne.s32.totalorder %s1626_s13, %s1306_s17  ;;  %p1311_p0 = scmp.lt.u32.totalorder %s1626_s13, %s1725_s29 }
 0x4f3   : > { %p1312_p1 = scmp.lt.u32.totalorder %s1310_s12, %s1306_s17  ;;  %p1314_p4 = scmp.lt.u32.totalorder %s1306_s17, %s1626_s13 }
 0x4f4   : > { %p1308_p12 = pnand %p1307_p11, %p1496_p3 }
 0x4f5   : > { %p1313_p2 = por %p1312_p1, %p1311_p0 }
 0x4f6   : > { %p1309_p13 = pneg %p1308_p12 }
 0x4f7   : > { %p1315_p5 = por %p1314_p4, %p1313_p2 }
 0x4f9   : > { %p1316_p6 = pnand %p1315_p5, %p1309_p13 }
 0x4fb   : > { %1319 = shalt.err (!%p1316_p6)
}
 0x4fc   : > { %1208 = dma.vmem_to_hbm [thread:$0]  (%p1496_p3), %s936_s20, 128, %s1626_s13, %s921_s1  }
 0x4fd PF: > { %s1727_s28 = sld [smem:[#allocation13_spill]]  ;;  %s1728_s2 = sld [smem:[#allocation8_spill]] }
 0x503   : > { %p1214_p7 = scmp.ge.s32.totalorder %s1727_s28, 2  ;;  %s947_s21 = sand.u32 1, %s1728_s2  }
 0x504   : > { %s948_s23 = scalar_lea.sflag [#allocation6], %s947_s21 }
 0x505   : > { %p1211_p8 = pnand %p1214_p7, %p1506_p9 }
 0x507   : > { %1353 = dma.done.wait (!%p1211_p8), %s948_s23, 128  }
 0x508   : > { %1355 = vsyncadd (!%p1211_p8), %s948_s23, 4294967168  ;;  %s23_s20 = sadd.s32 1, %s1727_s28   ;;  %s1730_s13 = sld [smem:[#allocation9_spill]] }
 0x509   : > { %p20_p10 = scmp.ge.s32.totalorder %s23_s20, 10   ;;  %s1731_s14 = sld [smem:[#allocation10_spill]] }
 0x50a   : > { %s1732_s15 = sld [smem:[#allocation18_spill]]  ;;  %s1733_s16 = sld [smem:[#allocation11_spill]] }
 0x50b   : > { %s1734_s17 = sld [smem:[#allocation12_spill]]  ;;  %s1735_s18 = sld [smem:[#allocation14_spill]] }
 0x50c   : > { %s1736_s19 = sld [smem:[#allocation16_spill]]  ;;  %22 = sbr.rel (!%p20_p10) target bundleno = 10 (0xa), region = 135 }
 0x513   :  { %953 = vsyncpa [#allocation6], 1 }
 0x514   :  { %955 = vsyncpa [#allocation6 + $0x1], 1 }

</bundles_post_ra>
